<compile_context>
chip_gen: v7x
topology: tpu7x:2x2x1
jax: 0.10.0
libtpu: 0.0.40
codegen_flags: <defaults>
</compile_context>

<pallas_src>
import functools

import jax
import jax.numpy as jnp
from jax.experimental import pallas as pl
from jax.experimental.pallas import tpu as pltpu

_LRELU_SLOPE = 0.01
_BN_EPS = 1e-5
# Per-step tile byte budget (sublane-padding aware).  Double-buffered => ~2x this,
# which stays well inside every generation's default scoped-VMEM limit.
_VMEM_STEP_BYTES = 4 * 1024 * 1024
_MAX_IMAGES_PER_STEP = 16  # cap on static unroll of the per-image matmul loop


def _round_up(x, m):
    return (x + m - 1) // m * m


def _conv_bn_lrelu_kernel(x_ref, w_ref, bias_ref, o_ref):
    # x_ref:    (nb, C_in, T)   pixel tile: channels on sublanes, pixels on lanes
    # w_ref:    (C_out, C_in)   1x1 conv weight with BN scale folded in (resident)
    # bias_ref: (C_out, 1)      folded BN bias (beta - mean * scale)   (resident)
    # o_ref:    (nb, C_out, T)  lane-dense output tile
    w = w_ref[...]
    b = bias_ref[...]
    nb = x_ref.shape[0]
    for i in range(nb):  # static, unrolled (nb <= _MAX_IMAGES_PER_STEP)
        y = jnp.dot(w, x_ref[i], preferred_element_type=jnp.float32) + b
        o_ref[i] = jnp.where(y > 0, y, _LRELU_SLOPE * y).astype(o_ref.dtype)


def _pick_tiles(N, C_in, C_out, HW, tm):
    """Choose (images per step, pixel-lane tile, #pixel tiles)."""
    # Bytes per pixel lane actually resident in VMEM (sublane-padded to 8).
    bytes_per_lane = (_round_up(C_in, 8) + _round_up(C_out, 8)) * 4
    vmem_lanes = max(128, (_VMEM_STEP_BYTES // bytes_per_lane) // 128 * 128)
    target = min(max(128, tm // 128 * 128), vmem_lanes)

    if HW % 128 == 0:
        lane_tile = min(target, HW)       # multiple of 128
    elif HW <= target:
        lane_tile = HW                    # full-extent block (allowed, no ragged block)
    else:
        lane_tile = target                # ragged last block; OOB lanes masked on store
    n_hw = pl.cdiv(HW, lane_tile)

    nb = 1
    if n_hw == 1:
        # Small images: batch several per grid step to amortize per-step overhead.
        nb = max(1, min(N, target // lane_tile, _MAX_IMAGES_PER_STEP))
        if N >= 2:
            nb = min(nb, (N + 1) // 2)    # keep >=2 grid blocks (v7x: feed both TCs)
        while nb > 1 and N % nb != 0:     # keep the batch axis exactly tiled
            nb -= 1
    return nb, lane_tile, n_hw


@functools.partial(jax.jit, static_argnames=("tm",))
def conv_block_forward(x_nchw, w_oi, bn_gamma, bn_beta, bn_mean, bn_var, *, tm=32768):
    """Forward of Conv_Block with kernel=(1,1), stride=(1,1), padding=(0,0), bias=False.

    x_nchw : (N, C_in, H, W)  float32
    w_oi   : (C_out, C_in)    1x1 conv weight (PyTorch (O,I,1,1) squeezed)
    returns: (N, C_out, H, W) float32
    """
    N, C_in, H, W = x_nchw.shape
    C_out = w_oi.shape[0]
    HW = H * W

    # Fold BatchNorm (eval, running stats) into the weight and a bias column.
    scale = bn_gamma / jnp.sqrt(bn_var + _BN_EPS)                    # (C_out,)
    w_scaled = (w_oi * scale[:, None]).astype(jnp.float32)           # (C_out, C_in)
    bias_col = (bn_beta - bn_mean * scale).reshape(C_out, 1).astype(jnp.float32)

    # Native-layout flatten: NCHW -> (N, C_in, H*W). No transpose, no pad.
    x_flat = x_nchw.reshape(N, C_in, HW).astype(jnp.float32)

    nb, lane_tile, n_hw = _pick_tiles(N, C_in, C_out, HW, tm)

    out = pl.pallas_call(
        _conv_bn_lrelu_kernel,
        out_shape=jax.ShapeDtypeStruct((N, C_out, HW), jnp.float32),
        grid_spec=pltpu.PrefetchScalarGridSpec(
            num_scalar_prefetch=0,
            grid=(N // nb, n_hw),
            in_specs=[
                # x: nb images x one pixel tile per grid step.
                pl.BlockSpec((nb, C_in, lane_tile), lambda g, j: (g, 0, j)),
                # weight / bias: tiny, resident (same block every step).
                pl.BlockSpec((C_out, C_in), lambda g, j: (0, 0)),
                pl.BlockSpec((C_out, 1), lambda g, j: (0, 0)),
            ],
            out_specs=pl.BlockSpec((nb, C_out, lane_tile), lambda g, j: (g, 0, j)),
        ),
        compiler_params=pltpu.CompilerParams(
            dimension_semantics=("parallel", "parallel")),
    )(x_flat, w_scaled, bias_col)

    # (N, C_out, H*W) -> NCHW: pure reshape, no transpose, no slice.
    return out.reshape(N, C_out, H, W)


def _reference(x_nchw, w_oi, bn_gamma, bn_beta, bn_mean, bn_var):
    y = jnp.einsum("nihw,oi->nohw", x_nchw, w_oi)
    scale = (bn_gamma / jnp.sqrt(bn_var + _BN_EPS)).reshape(1, -1, 1, 1)
    bias = (bn_beta - bn_mean * bn_gamma / jnp.sqrt(bn_var + _BN_EPS)).reshape(1, -1, 1, 1)
    y = y * scale + bias
    return jnp.where(y > 0, y, _LRELU_SLOPE * y)


if __name__ == "__main__":
    key = jax.random.PRNGKey(0)
    k_x, k_w, k_g, k_b, k_m, k_v, k_x2 = jax.random.split(key, 7)

    # Primary test: shapes consistent with the module spec.
    N, C_in, C_out, H, W = 2, 4, 8, 16, 16
    x = jax.random.normal(k_x, (N, C_in, H, W), dtype=jnp.float32)
    w = jax.random.normal(k_w, (C_out, C_in), dtype=jnp.float32) * 0.1
    bn_gamma = 1.0 + 0.1 * jax.random.normal(k_g, (C_out,), dtype=jnp.float32)
    bn_beta = 0.1 * jax.random.normal(k_b, (C_out,), dtype=jnp.float32)
    bn_mean = 0.05 * jax.random.normal(k_m, (C_out,), dtype=jnp.float32)
    bn_var = jnp.abs(1.0 + 0.1 * jax.random.normal(k_v, (C_out,), dtype=jnp.float32))

    out = conv_block_forward(x, w, bn_gamma, bn_beta, bn_mean, bn_var)
    out = jax.block_until_ready(out)
    ref = _reference(x, w, bn_gamma, bn_beta, bn_mean, bn_var)
    assert out.shape == (N, C_out, H, W)
    assert jnp.allclose(out, ref, atol=1e-5, rtol=1e-5), "mismatch vs reference (main)"

    # Secondary test: H*W not a multiple of the tile -> exercises the ragged
    # last-block path (no wrapper pad / slice) with a deliberately small tile.
    N2, H2, W2 = 3, 19, 19
    x2 = jax.random.normal(k_x2, (N2, C_in, H2, W2), dtype=jnp.float32)
    out2 = conv_block_forward(x2, w, bn_gamma, bn_beta, bn_mean, bn_var, tm=128)
    out2 = jax.block_until_ready(out2)
    ref2 = _reference(x2, w, bn_gamma, bn_beta, bn_mean, bn_var)
    assert out2.shape == (N2, C_out, H2, W2)
    assert jnp.allclose(out2, ref2, atol=1e-5, rtol=1e-5), "mismatch vs reference (ragged)"

    print("KERNEL_OK")
</pallas_src>

<mosaic_0001>
module attributes {stable_mosaic.version = 11 : i64} {
  func.func @_conv_bn_lrelu_kernel(%arg0: i32, %arg1: i32, %arg2: memref<1x4x256xf32, #tpu.memory_space<vmem>>, %arg3: memref<8x4xf32, #tpu.memory_space<vmem>>, %arg4: memref<8x1xf32, #tpu.memory_space<vmem>>, %arg5: memref<1x8x256xf32, #tpu.memory_space<vmem>>) attributes {dimension_semantics = [#tpu.dimension_semantics<parallel>, #tpu.dimension_semantics<parallel>], iteration_bounds = array<i64: 2, 1>, scalar_prefetch = 0 : i64, scratch_operands = 0 : i64, tpu.core_type = #tpu.core_type<tc>, window_params = [{transform_indices = @transform_0, window_bounds = array<i64: 1, 4, 256>}, {pipeline_mode = #tpu.pipeline_mode<synchronous>, transform_indices = @transform_1, window_bounds = array<i64: 8, 4>}, {pipeline_mode = #tpu.pipeline_mode<synchronous>, transform_indices = @transform_2, window_bounds = array<i64: 8, 1>}, {transform_indices = @transform_3, window_bounds = array<i64: 1, 8, 256>}]} {
    %c0 = arith.constant 0 : index
    %c0_0 = arith.constant 0 : index
    %0 = vector.load %arg3[%c0, %c0_0] : memref<8x4xf32, #tpu.memory_space<vmem>>, vector<8x4xf32>
    %c0_1 = arith.constant 0 : index
    %c0_2 = arith.constant 0 : index
    %1 = vector.load %arg4[%c0_1, %c0_2] : memref<8x1xf32, #tpu.memory_space<vmem>>, vector<8x1xf32>
    %c0_3 = arith.constant 0 : index
    %c0_4 = arith.constant 0 : index
    %c0_5 = arith.constant 0 : index
    %2 = vector.load %arg2[%c0_3, %c0_4, %c0_5] : memref<1x4x256xf32, #tpu.memory_space<vmem>>, vector<1x4x256xf32>
    %3 = vector.shape_cast %2 : vector<1x4x256xf32> to vector<4x256xf32>
    %cst = arith.constant dense<0.000000e+00> : vector<8x256xf32>
    %4 = tpu.matmul %0, %3, %cst {dimension_numbers = #tpu.dot_dimension_numbers<[1], [0], [0], [1], [0, 0, 1, 1], [], []>} : vector<8x4xf32>, vector<4x256xf32>, vector<8x256xf32> -> vector<8x256xf32>
    %5 = vector.broadcast %1 : vector<8x1xf32> to vector<8x256xf32>
    %6 = arith.addf %4, %5 : vector<8x256xf32>
    %cst_6 = arith.constant 0.000000e+00 : f32
    %7 = vector.broadcast %cst_6 : f32 to vector<8x256xf32>
    %8 = arith.cmpf ogt, %6, %7 : vector<8x256xf32>
    %cst_7 = arith.constant 0.00999999977 : f32
    %9 = vector.broadcast %cst_7 : f32 to vector<8x256xf32>
    %10 = arith.mulf %9, %6 : vector<8x256xf32>
    %11 = arith.select %8, %6, %10 : vector<8x256xi1>, vector<8x256xf32>
    %c0_8 = arith.constant 0 : index
    %c0_9 = arith.constant 0 : index
    %c0_10 = arith.constant 0 : index
    %12 = vector.load %arg5[%c0_8, %c0_9, %c0_10] : memref<1x8x256xf32, #tpu.memory_space<vmem>>, vector<1x8x256xf32>
    %13 = vector.shape_cast %12 : vector<1x8x256xf32> to vector<8x256xf32>
    %14 = vector.shape_cast %11 : vector<8x256xf32> to vector<1x8x256xf32>
    tpu.vector_store %arg5[%c0_8, %c0_9, %c0_10], %14 {strides = array<i32>} : memref<1x8x256xf32, #tpu.memory_space<vmem>>, vector<1x8x256xf32>,
    return
  }
  func.func @transform_0(%arg0: i32, %arg1: i32) -> (i32, i32, i32) {
    %c0_i32 = arith.constant 0 : i32
    %c0_i32_0 = arith.constant 0 : i32
    return %arg0, %c0_i32, %arg1 : i32, i32, i32
  }
  func.func @transform_1(%arg0: i32, %arg1: i32) -> (i32, i32) {
    %c0_i32 = arith.constant 0 : i32
    %c0_i32_0 = arith.constant 0 : i32
    %c0_i32_1 = arith.constant 0 : i32
    return %c0_i32, %c0_i32_0 : i32, i32
  }
  func.func @transform_2(%arg0: i32, %arg1: i32) -> (i32, i32) {
    %c0_i32 = arith.constant 0 : i32
    %c0_i32_0 = arith.constant 0 : i32
    %c0_i32_1 = arith.constant 0 : i32
    return %c0_i32, %c0_i32_0 : i32, i32
  }
  func.func @transform_3(%arg0: i32, %arg1: i32) -> (i32, i32, i32) {
    %c0_i32 = arith.constant 0 : i32
    %c0_i32_0 = arith.constant 0 : i32
    return %arg0, %c0_i32, %arg1 : i32, i32, i32
  }
}

</mosaic_0001>

<bundles_post_ra>
// kernel: conv_block_forward.1
= control target key start
LH: loop header
LB: loop body
LE: loop exit
PB: predicated region body
PF: predicated region fallthrough
CT: control target
= control target key end

     0   :  { %s485_s12 = smov 0   ;;  %s487_s13 = smov 0   ;;  %s524_s0 = inlined_call_operand.vmem [shape: f32[2,4,256], index: 0, kind: input, shape index: {}]   ;;  %s525_s1 = inlined_call_operand.vmem [shape: f32[8,4], index: 1, kind: input, shape index: {}]   ;;  %s526_s2 = inlined_call_operand.vmem [shape: f32[8,1], index: 2, kind: input, shape index: {}]   ;;  %s527_s3 = inlined_call_operand.vmem [shape: f32[2,8,256], index: 3, kind: output, shape index: {}]  }
   0x1   :  { %s489_s14 = smov 0  }
   0x2 LB: > { %s25_s15 = sadd.s32 1, %s457_s13  ;;  %p399_p0 = scmp.ge.s32.totalorder %s461_s14, 1  ;;  %s461_s14 = sphi %s489_s14, %s13_s14   ;;  %s457_s13 = sphi %s487_s13, %s529_s13   ;;  %s453_s12 = sphi %s485_s12, %s528_s12  }
   0x3   : > { %p27_p1 = scmp.ge.s32.totalorder %s25_s15, 2  ;;  %p158_p2 = scmp.lt.s32.totalorder %s461_s14, 3 }
   0x5   : > { %s531_s15 = smov (%p27_p1, %s25_s15), 0  ;;  %p159_p3 = pnand %p399_p0, %p158_p2 }
   0x6   : > { %p191_p4 = scmp.lt.s32.totalorder (!%p159_p3), %s453_s12, 1  ;;  %v463_v0 = vmov (!%p159_p3), 0.0   ;;  %v464_v1 = vmov (!%p159_p3), 0   ;;  %v211_v2 = vld [vmem:[%s526_s2] sm:$0xff] (!%p159_p3)  ;;  %vm224_vm0 = vcmask (!%p159_p3), 1043456   ;;  %vm220_vm1 = vcmask (!%p159_p3), 31744  }
   0x7   : > { %162 = sbr.rel (%p159_p3) target bundleno = 241 (0xf1), region = 32  ;;  %293 = vmatprep.mubr.f32.mxu0 (!%p159_p3), %v463_v0  ;;  %437 = vset.pattern.permute.xlu0 (!%p159_p3), %v464_v1  ;;  %v210_v5 = vld [vmem:[%s525_s1] sm:$0xff] (!%p159_p3) }
   0x8   : > { %215 = vperm.xlu0 (!%p159_p3), %437, %v211_v2  }
   0xe   : > { %s533_s12 = smov (!%p191_p4, %s453_s12), 1 }
   0xf   : > { %s409_s18 = sshll.u32 %s533_s12, 3  ;;  %s410_s24 = sshll.u32 %s533_s12, 4 }
  0x10   : > { %s198_s21 = scalar_lea.vmem %s524_s0, %s409_s18  ;;  %s208_s27 = scalar_lea.vmem %s527_s3, %s410_s24 }
  0x11   : > { %v212_v3 = vld [vmem:[%s198_s21] sm:$0xff] }
  0x12   : > { %v219_v4 = vcombine.high %v212_v3, %v212_v3 }
  0x14   : > { %404 = vmatprep.subr.msk.mxu0 %vm224_vm0, %v219_v4 }
  0x15   : > { %405 = vmatpush1.msk.msra.mxu0 %vm224_vm0, %v212_v3 }
  0x16   : > { %406 = vmatmul.mubr.msk.f32.vlgmr.msra.gmra.mrb[0].mxu0 %vm220_vm1, %v210_v5 }
  0x87   : > { %v216_v6 = vpop.permute.xlu0 %215 }
  0xe9   : > { %v295_v7 = vpop.f32.mrb[0].mxu0 }
  0xea   : > { %v296_v8 = vadd.f32 %v295_v7, %v216_v6  ;;  %v297_v9 = vpop.f32.mrb[1].mxu0 }
  0xeb   : > { %v298_v10 = vadd.f32 %v297_v9, %v216_v6 }
  0xec   : > { %vm300_vm2 = vcmp.gt.f32.partialorder %v296_v8, 0.0  ;;  %v302_v11 = vmul.f32 0.01, %v296_v8 }
  0xed   : > { %vm301_vm3 = vcmp.gt.f32.partialorder %v298_v10, 0.0  ;;  %v303_v12 = vmul.f32 0.01, %v298_v10 }
  0xee   : > { %v304_v13 = vsel %vm300_vm2, %v296_v8, %v302_v11 }
  0xef   : > { %306 = vst [vmem:[%s208_s27] sm:$0xff] %v304_v13  ;;  %v305_v14 = vsel %vm301_vm3, %v298_v10, %v303_v12 }
  0xf0   : > { %307 = vst [vmem:[%s208_s27 + $0x8] sm:$0xff] %v305_v14 }
  0xf1 PF: > { %s13_s14 = sadd.s32 1, %s461_s14   ;;  %s528_s12 = smov %s457_s13 }
  0xf2   : > { %p10_p5 = scmp.ge.s32.totalorder %s13_s14, 4   ;;  %s529_s13 = smov %s531_s15 }
  0xf4   :  { %12 = sbr.rel (!%p10_p5) target bundleno = 2 (0x2), region = 62 }

</bundles_post_ra>
